<compile_context>
chip_gen: v7x
topology: tpu7x:2x2x1
jax: 0.10.0
libtpu: 0.0.40
codegen_flags: <defaults>
</compile_context>

<pallas_src>
import functools

import jax
import jax.numpy as jnp
from jax import lax
from jax.experimental import pallas as pl
from jax.experimental.pallas import tpu as pltpu


def _style_loss_kernel(fin_ref, ftgt_ref, out_ref, acc_ref, *, inv_norm, inv_mm):
    """One K-tile step: accumulate the Gram-matrix difference, finalize at end.

    fin_ref / ftgt_ref: (Mp, tk) feature tiles in VMEM (native dtype).
    out_ref:            (1, 1) scalar result in SMEM.
    acc_ref:            (Mp, Mp) f32 accumulator (persists across grid steps).
    """
    k = pl.program_id(0)

    @pl.when(k == 0)
    def _init():
        acc_ref[...] = jnp.zeros_like(acc_ref)

    fin = fin_ref[...]
    ftgt = ftgt_ref[...]

    # Contract over the last dim of both operands -> F @ F^T without forming a
    # transposed copy (goes straight to the MXU, f32 accumulation).
    dn = (((1,), (1,)), ((), ()))
    g_in = lax.dot_general(fin, fin, dn, preferred_element_type=jnp.float32)
    g_tgt = lax.dot_general(ftgt, ftgt, dn, preferred_element_type=jnp.float32)
    acc_ref[...] += g_in - g_tgt

    @pl.when(k == pl.num_programs(0) - 1)
    def _finalize():
        # Fold the Gram normalization and the MSE mean into scalars.
        diff = acc_ref[...] * jnp.float32(inv_norm)
        out_ref[0, 0] = jnp.sum(diff * diff) * jnp.float32(inv_mm)


def _round_up(x: int, m: int) -> int:
    return ((x + m - 1) // m) * m


def style_loss(input_map: jax.Array, target_map: jax.Array) -> jax.Array:
    """Equivalent of StyleLoss().forward(input_map, target_map) in PyTorch."""
    assert input_map.shape == target_map.shape
    a, b, c, d = input_map.shape
    m, k = a * b, c * d

    # Flatten to (a*b, c*d) feature matrices (same as torch .view); keep the
    # native dtype (no forced f32 upcast) -- the matmul accumulates in f32.
    f_in = input_map.reshape(m, k)
    f_tgt = target_map.reshape(m, k)

    # Pad M to a sublane multiple; zero rows contribute zero to both Grams, so
    # the difference (and the MSE over the true M*M entries) is unchanged.
    mp = _round_up(m, 8)

    # Pick a K tile: multiple of 128 lanes, bounded so the double-buffered
    # input tiles stay well within the scoped VMEM limit on all generations
    # (2 inputs x 2 buffers x Mp x tk x bytes  <=  ~16 MiB), capped at 4096.
    bytes_per = jnp.dtype(f_in.dtype).itemsize
    budget = 16 * 1024 * 1024
    tk = max(128, (budget // (4 * mp * bytes_per)) // 128 * 128)
    tk = min(tk, 4096, _round_up(k, 128))

    # Zero-pad the K tail so the last block contains no garbage lanes.
    kp = _round_up(k, tk)
    if mp > m or kp > k:
        pad = ((0, mp - m), (0, kp - k))
        f_in = jnp.pad(f_in, pad)
        f_tgt = jnp.pad(f_tgt, pad)

    num_k = kp // tk
    norm = float(a * b * c * d)

    kernel = functools.partial(
        _style_loss_kernel,
        inv_norm=1.0 / norm,
        inv_mm=1.0 / float(m * m),
    )

    out = pl.pallas_call(
        kernel,
        out_shape=jax.ShapeDtypeStruct((1, 1), jnp.float32),
        grid_spec=pltpu.PrefetchScalarGridSpec(
            num_scalar_prefetch=0,
            grid=(num_k,),
            in_specs=[
                pl.BlockSpec((mp, tk), lambda i: (0, i)),
                pl.BlockSpec((mp, tk), lambda i: (0, i)),
            ],
            out_specs=pl.BlockSpec(memory_space=pltpu.SMEM),
            scratch_shapes=[pltpu.VMEM((mp, mp), jnp.float32)],
        ),
        compiler_params=pltpu.CompilerParams(
            dimension_semantics=("arbitrary",),
        ),
    )(f_in, f_tgt)
    return out[0, 0]


def _reference_style_loss(input_map, target_map):
    a, b, c, d = input_map.shape
    f_in = input_map.reshape(a * b, c * d)
    f_tgt = target_map.reshape(a * b, c * d)
    g_in = (f_in @ f_in.T) / (a * b * c * d)
    g_tgt = (f_tgt @ f_tgt.T) / (a * b * c * d)
    return jnp.mean((g_in - g_tgt) ** 2)


if __name__ == "__main__":
    key = jax.random.PRNGKey(0)
    k1, k2 = jax.random.split(key)

    # Small NCHW feature maps: batch=2, channels=4, spatial=16x16.
    x = jax.random.normal(k1, (2, 4, 16, 16), dtype=jnp.float32)
    y = jax.random.normal(k2, (2, 4, 16, 16), dtype=jnp.float32)

    loss = style_loss(x, y)
    jax.block_until_ready(loss)

    ref = _reference_style_loss(x, y)
    assert jnp.allclose(loss, ref, rtol=1e-5, atol=1e-6), (loss, ref)

    print("KERNEL_OK")
</pallas_src>

<mosaic_0001>
module attributes {stable_mosaic.version = 11 : i64} {
  func.func @_style_loss_kernel(%arg0: i32, %arg1: memref<8x256xf32, #tpu.memory_space<vmem>>, %arg2: memref<8x256xf32, #tpu.memory_space<vmem>>, %arg3: memref<1x1xf32, #tpu.memory_space<smem>>, %arg4: memref<8x8xf32, #tpu.memory_space<vmem>>) attributes {dimension_semantics = [#tpu.dimension_semantics<arbitrary>], iteration_bounds = array<i64: 1>, scalar_prefetch = 0 : i64, scratch_operands = 1 : i64, tpu.core_type = #tpu.core_type<tc>, window_params = [{transform_indices = @transform_0, window_bounds = array<i64: 8, 256>}, {transform_indices = @transform_1, window_bounds = array<i64: 8, 256>}, {transform_indices = @transform_2, window_bounds = array<i64: 1, 1>}]} {
    %c0_i32 = arith.constant 0 : i32
    %0 = arith.cmpi eq, %arg0, %c0_i32 : i32
    %1 = arith.extui %0 : i1 to i32
    %c0_i32_0 = arith.constant 0 : i32
    %2 = arith.cmpi ne, %1, %c0_i32_0 : i32
    scf.if %2 {
      %cst_11 = arith.constant 0.000000e+00 : f32
      %14 = vector.broadcast %cst_11 : f32 to vector<8x8xf32>
      %c0_12 = arith.constant 0 : index
      %c0_13 = arith.constant 0 : index
      %15 = vector.load %arg4[%c0_12, %c0_13] : memref<8x8xf32, #tpu.memory_space<vmem>>, vector<8x8xf32>
      tpu.vector_store %arg4[%c0_12, %c0_13], %14 {strides = array<i32>} : memref<8x8xf32, #tpu.memory_space<vmem>>, vector<8x8xf32>,
    } else {
    }
    %c0 = arith.constant 0 : index
    %c0_1 = arith.constant 0 : index
    %3 = vector.load %arg1[%c0, %c0_1] : memref<8x256xf32, #tpu.memory_space<vmem>>, vector<8x256xf32>
    %c0_2 = arith.constant 0 : index
    %c0_3 = arith.constant 0 : index
    %4 = vector.load %arg2[%c0_2, %c0_3] : memref<8x256xf32, #tpu.memory_space<vmem>>, vector<8x256xf32>
    %cst = arith.constant dense<0.000000e+00> : vector<8x8xf32>
    %5 = tpu.matmul %3, %3, %cst {dimension_numbers = #tpu.dot_dimension_numbers<[1], [1], [0], [0], [0, 0, 1, 0], [], []>} : vector<8x256xf32>, vector<8x256xf32>, vector<8x8xf32> -> vector<8x8xf32>
    %cst_4 = arith.constant dense<0.000000e+00> : vector<8x8xf32>
    %6 = tpu.matmul %4, %4, %cst_4 {dimension_numbers = #tpu.dot_dimension_numbers<[1], [1], [0], [0], [0, 0, 1, 0], [], []>} : vector<8x256xf32>, vector<8x256xf32>, vector<8x8xf32> -> vector<8x8xf32>
    %c0_5 = arith.constant 0 : index
    %c0_6 = arith.constant 0 : index
    %7 = vector.load %arg4[%c0_5, %c0_6] : memref<8x8xf32, #tpu.memory_space<vmem>>, vector<8x8xf32>
    %8 = arith.subf %5, %6 : vector<8x8xf32>
    %9 = arith.addf %7, %8 : vector<8x8xf32>
    %c0_7 = arith.constant 0 : index
    %c0_8 = arith.constant 0 : index
    %10 = vector.load %arg4[%c0_7, %c0_8] : memref<8x8xf32, #tpu.memory_space<vmem>>, vector<8x8xf32>
    tpu.vector_store %arg4[%c0_7, %c0_8], %9 {strides = array<i32>} : memref<8x8xf32, #tpu.memory_space<vmem>>, vector<8x8xf32>,
    %c0_i32_9 = arith.constant 0 : i32
    %11 = arith.cmpi eq, %arg0, %c0_i32_9 : i32
    %12 = arith.extui %11 : i1 to i32
    %c0_i32_10 = arith.constant 0 : i32
    %13 = arith.cmpi ne, %12, %c0_i32_10 : i32
    scf.if %13 {
      %c0_11 = arith.constant 0 : index
      %c0_12 = arith.constant 0 : index
      %14 = vector.load %arg4[%c0_11, %c0_12] : memref<8x8xf32, #tpu.memory_space<vmem>>, vector<8x8xf32>
      %cst_13 = arith.constant 4.8828125E-4 : f32
      %15 = vector.broadcast %cst_13 : f32 to vector<8x8xf32>
      %16 = arith.mulf %14, %15 : vector<8x8xf32>
      %17 = arith.mulf %16, %16 : vector<8x8xf32>
      %18 = vector.shape_cast %17 : vector<8x8xf32> to vector<1x8x8xf32>
      %cst_14 = arith.constant dense<0.000000e+00> : vector<1xf32>
      %19 = vector.multi_reduction <add>, %18, %cst_14 [1, 2] : vector<1x8x8xf32> to vector<1xf32>
      %20 = vector.shape_cast %19 : vector<1xf32> to vector<1x1x1xf32>
      %21 = vector.extract %20[0, 0, 0] : f32 from vector<1x1x1xf32>
      %cst_15 = arith.constant 1.562500e-02 : f32
      %22 = arith.mulf %21, %cst_15 : f32
      %c0_16 = arith.constant 0 : index
      %c0_17 = arith.constant 0 : index
      %23 = memref.load %arg3[%c0_16, %c0_17] : memref<1x1xf32, #tpu.memory_space<smem>>
      memref.store %22, %arg3[%c0_16, %c0_17] : memref<1x1xf32, #tpu.memory_space<smem>>
    } else {
    }
    return
  }
  func.func @transform_0(%arg0: i32) -> (i32, i32) {
    %c0_i32 = arith.constant 0 : i32
    %c0_i32_0 = arith.constant 0 : i32
    return %c0_i32, %arg0 : i32, i32
  }
  func.func @transform_1(%arg0: i32) -> (i32, i32) {
    %c0_i32 = arith.constant 0 : i32
    %c0_i32_0 = arith.constant 0 : i32
    return %c0_i32, %arg0 : i32, i32
  }
  func.func @transform_2(%arg0: i32) -> (i32, i32) {
    %c0_i32 = arith.constant 0 : i32
    %c0_i32_0 = arith.constant 0 : i32
    %c0_i32_1 = arith.constant 0 : i32
    return %c0_i32, %c0_i32_0 : i32, i32
  }
}

</mosaic_0001>

<bundles_post_ra>
// kernel: tpu_custom_call.1
= control target key start
LH: loop header
LB: loop body
LE: loop exit
PB: predicated region body
PF: predicated region fallthrough
CT: control target
= control target key end

     0   :  { %7 = vsyncpa [#allocation4], 0  ;;  %s346_s0 = inlined_call_operand.hbm [shape: f32[8,256], index: 0, kind: input, shape index: {}]   ;;  %s347_s1 = inlined_call_operand.hbm [shape: f32[8,256], index: 1, kind: input, shape index: {}]   ;;  %s348_s2 = inlined_call_operand.hbm [shape: f32[1,1], index: 2, kind: output, shape index: {}]  }
   0x1   :  { %8 = vsyncpa [#allocation7], 0 }
   0x2   :  { %9 = vsyncpa [#allocation5], 0  ;;  %s291_s9 = smov [#allocation3]   ;;  %s292_s11 = smov [#allocation6]  }
   0x3   :  { %s16_s10 = sshll.u32 %s291_s9, 4  ;;  %s26_s12 = sshll.u32 %s292_s11, 4  ;;  %s17_s10 = int_to_ptr.vmem [resolvable:$true] %s16_s10  ;;  %s27_s12 = int_to_ptr.vmem [resolvable:$true] %s26_s12 }
   0x4   :  { %s231_s15 = scalar_lea.hbm %s346_s0, 256 }
   0x5   :  { %p232_p0 = scmp.ne.s32.totalorder %s346_s0, %s231_s15  ;;  %p235_p1 = scmp.lt.u32.totalorder %s231_s15, %s346_s0 }
   0x7   :  { %p237_p2 = pnand %p235_p1, %p232_p0 }
   0x9   :  { %240 = shalt.err (!%p237_p2)
}
   0xa   :  { %s241_s20 = scalar_lea.vmem %s17_s10, 256  ;;  %p246_p4 = scmp.lt.s32.totalorder %s17_s10, %s17_s10 }
   0xb   :  { %p242_p3 = scmp.ne.s32.totalorder %s17_s10, %s241_s20  ;;  %p247_p5 = scmp.lt.s32.totalorder %s241_s20, %s241_s20 }
   0xd   :  { %p248_p6 = por %p247_p5, %p246_p4 }
   0xf   :  { %p249_p7 = pnand %p248_p6, %p242_p3 }
  0x11   :  { %252 = shalt.err (!%p249_p7)
}
  0x12   :  { %19 = dma.hbm_to_vmem [thread:$0]  %s346_s0, 256, %s17_s10, [#allocation4]  }
  0x13   :  { %s253_s25 = scalar_lea.hbm %s347_s1, 256 }
  0x14   :  { %p254_p8 = scmp.ne.s32.totalorder %s347_s1, %s253_s25  ;;  %p257_p9 = scmp.lt.u32.totalorder %s253_s25, %s347_s1 }
  0x16   :  { %p259_p10 = pnand %p257_p9, %p254_p8 }
  0x18   :  { %262 = shalt.err (!%p259_p10)
}
  0x19   :  { %s263_s30 = scalar_lea.vmem %s27_s12, 256  ;;  %p268_p12 = scmp.lt.s32.totalorder %s27_s12, %s27_s12 }
  0x1a   :  { %p264_p11 = scmp.ne.s32.totalorder %s27_s12, %s263_s30  ;;  %p269_p13 = scmp.lt.s32.totalorder %s263_s30, %s263_s30 }
  0x1c   :  { %p270_p0 = por %p269_p13, %p268_p12 }
  0x1e   :  { %p271_p1 = pnand %p270_p0, %p264_p11 }
  0x20   :  { %274 = shalt.err (!%p271_p1)
}
  0x21   :  { %29 = dma.hbm_to_vmem [thread:$0]  %s347_s1, 256, %s27_s12, [#allocation7]  }
  0x22   :  { %285 = dma.done.wait [#allocation4], 256  }
  0x23   :  { %286 = vsyncadd [#allocation4], 4294967040 }
  0x24   :  { %287 = dma.done.wait [#allocation7], 256  }
  0x25   :  { %288 = vsyncadd [#allocation7], 4294967040  ;;  %v43_v0 = vld [vmem:[#allocation3 + $0x8] sm:$0xff]  ;;  %v45_v1 = vld [vmem:[#allocation6 + $0x8] sm:$0xff]  ;;  %vm40_vm0 = vcmask 64512   ;;  %v293_v4 = vmov 0.0  }
  0x26   :  { %v42_v2 = vld [vmem:[#allocation3] sm:$0xff]  ;;  %46 = vmatprep.subr.mxu0 %v43_v0  ;;  %116 = vmatprep.subr.mxu1 %v45_v1  ;;  %v44_v3 = vld [vmem:[#allocation6] sm:$0xff]  ;;  %41 = vst.msk [vmem:[#allocation2] sm:$0xff] %vm40_vm0, %v293_v4  ;;  %s275_s7 = scalar_lea.hbm %s348_s2, 16 }
  0x27   :  { %47 = vmatpush1.xpose.msra.mxu0 %v42_v2  ;;  %117 = vmatpush1.xpose.msra.mxu1 %v44_v3  ;;  %p276_p2 = scmp.ne.s32.totalorder %s348_s2, %s275_s7  ;;  %p279_p3 = scmp.lt.u32.totalorder %s275_s7, %s348_s2 }
  0x28   :  { %110 = vmatprep.mubr.f32.mxu0 %v43_v0  ;;  %180 = vmatprep.mubr.f32.mxu1 %v45_v1 }
  0x29   :  { %p281_p4 = pnand %p279_p3, %p276_p2 }
  0x2a   :  { %111 = vmatmul.mubr.f32.vlgmr.msra.gmra.mrb[0].mxu0 %v42_v2  ;;  %181 = vmatmul.mubr.f32.vlgmr.msra.gmra.mrb[0].mxu1 %v44_v3 }
  0x2d   :  { %v186_v7 = vld [vmem:[#allocation2] sm:$0xff] }
  0xfd   :  { %v112_v5 = vpop.f32.mrb[0].mxu0  ;;  %v182_v6 = vpop.f32.mrb[0].mxu1 }
  0xfe   :  { %v187_v8 = vsub.f32 %v112_v5, %v182_v6  ;;  %v114_v9 = vpop.f32.mrb[1].mxu0  ;;  %v184_v10 = vpop.f32.mrb[1].mxu1 }
 0x100   :  { %v188_v11 = vadd.f32 %v187_v8, %v186_v7 }
 0x102   :  { %190 = vst.msk [vmem:[#allocation2] sm:$0xff] %vm40_vm0, %v188_v11 }
 0x109   :  { %v194_v12 = vld [vmem:[#allocation2] sm:$0xff] }
 0x10a   :  { %v195_v13 = vmul.f32 0.00048828125, %v194_v12 }
 0x10c   :  { %v196_v14 = vmul.f32 %v195_v13, %v195_v13 }
 0x10e   :  { %v197_v15 = vsel %vm40_vm0, %v196_v14, 0.0 }
 0x10f   :  { %198 = vadd.xlane.f32.xlu0 %v197_v15 }
 0x19c   :  { %v199_v16 = vpop.xlane.xlu0 %198 }
 0x19d   :  { %v200_v17 = vrot.slane %v199_v16, 4 }
 0x19f   :  { %v201_v18 = vadd.f32 %v200_v17, %v199_v16 }
 0x1a1   :  { %v202_v19 = vrot.slane %v201_v18, 2 }
 0x1a3   :  { %v203_v20 = vadd.f32 %v202_v19, %v201_v18 }
 0x1a5   :  { %v204_v21 = vrot.slane %v203_v20, 1 }
 0x1a7   :  { %v205_v22 = vadd.f32 %v204_v21, %v203_v20 }
 0x1a9   :  { %225 = vpush %v205_v22 }
 0x1da   :  { %s226_s1 = spop %225 }
 0x1db   :  { %s207_s4 = smul.f32 0.015625, %s226_s1 }
 0x1dd   :  { %209 = sst [smem:[#allocation8]] %s207_s4 }
 0x1de   :  { %284 = shalt.err (!%p281_p4)
}
 0x1df   :  { %s294_s12 = smov [#allocation8]  }
 0x1e0   :  { %217 = dma.smem_to_hbm %s294_s12, 16, %s348_s2, [#allocation5]  }
 0x1e1   :  { %289 = dma.done.wait [#allocation5], 16  }
 0x1e2   :  { %290 = vsyncadd [#allocation5], 4294967280 }
 0x1e3   :  { %221 = sfence }
 0x1e4   :  { %222 = vsyncpa [#allocation4], 1 }
 0x1e5   :  { %223 = vsyncpa [#allocation7], 1 }
 0x1e6   :  { %224 = vsyncpa [#allocation5], 1 }

</bundles_post_ra>
